<compile_context>
chip_gen: v6e
topology: v6e:2x2x1
jax: 0.10.0
libtpu: 0.0.40
codegen_flags: <defaults>
</compile_context>

<pallas_src>
import functools

import jax
import jax.numpy as jnp
from jax import lax
from jax.experimental import pallas as pl
from jax.experimental.pallas import tpu as pltpu


# ----------------------------------------------------------------------------
# Stage 1: depthwise conv (VPU), stride-1 "valid" over a pre-padded input.
# ----------------------------------------------------------------------------
def _depthwise_kernel(x_ref, wd_ref, bd_ref, o_ref, *, ch, k, ho, wo):
    """One batch element.

    x_ref : (1, ch, Hp, Wp)  padded input tile (VMEM)
    wd_ref: (ch*k*k,)        depthwise weights, flattened row-major (SMEM)
    bd_ref: (ch,)            depthwise bias (SMEM)
    o_ref : (1, ch, ho, wo)  stride-1 valid output tile (VMEM)
    """
    for c in range(ch):
        xc = x_ref[0, c]  # (Hp, Wp) -- single VMEM load per channel
        acc = jnp.zeros((ho, wo), jnp.float32)
        for i in range(k):
            for j in range(k):
                w = wd_ref[c * k * k + i * k + j]  # scalar from SMEM
                acc = acc + xc[i:i + ho, j:j + wo].astype(jnp.float32) * w
        o_ref[0, c] = (acc + bd_ref[c]).astype(o_ref.dtype)


def _depthwise_conv(xp, wd_flat, bd, *, ch, k, h1, w1):
    n, _, hp, wp = xp.shape
    kern = functools.partial(_depthwise_kernel, ch=ch, k=k, ho=h1, wo=w1)
    return pl.pallas_call(
        kern,
        out_shape=jax.ShapeDtypeStruct((n, ch, h1, w1), xp.dtype),
        grid_spec=pltpu.PrefetchScalarGridSpec(
            num_scalar_prefetch=0,
            grid=(n,),
            in_specs=[
                pl.BlockSpec((1, ch, hp, wp), lambda b: (b, 0, 0, 0)),
                pl.BlockSpec(memory_space=pltpu.MemorySpace.SMEM),
                pl.BlockSpec(memory_space=pltpu.MemorySpace.SMEM),
            ],
            out_specs=pl.BlockSpec((1, ch, h1, w1), lambda b: (b, 0, 0, 0)),
        ),
        compiler_params=pltpu.CompilerParams(
            dimension_semantics=("parallel",)),
    )(xp, wd_flat, bd)


# ----------------------------------------------------------------------------
# Stage 2: pointwise 1x1 conv as an MXU matmul, lane-dense over H*W.
# ----------------------------------------------------------------------------
def _pointwise_kernel(y_ref, wp_ref, bp_ref, o_ref):
    """y_ref: (1, ch_in, TM)  wp_ref: (ch_out, ch_in)  bp_ref: (ch_out, 1)
    o_ref: (1, ch_out, TM)"""
    acc = jnp.dot(wp_ref[...], y_ref[0], preferred_element_type=jnp.float32)
    o_ref[0] = (acc + bp_ref[...]).astype(o_ref.dtype)


def _pick_spatial_tile(m, target=2048):
    # One block if small; otherwise the largest multiple of 128 <= target that
    # divides m (keeps each block ~<= 1 MiB even for wide channel counts).
    if m <= target or m % 128 != 0:
        return m
    t = (target // 128) * 128
    while m % t != 0:
        t -= 128
    return max(t, 128)


def _pointwise_conv(y2, w_point, b_point):
    n, ch_in, m = y2.shape
    ch_out = w_point.shape[0]
    tm = _pick_spatial_tile(m)
    grid = (n, m // tm)
    return pl.pallas_call(
        _pointwise_kernel,
        out_shape=jax.ShapeDtypeStruct((n, ch_out, m), y2.dtype),
        grid_spec=pltpu.PrefetchScalarGridSpec(
            num_scalar_prefetch=0,
            grid=grid,
            in_specs=[
                pl.BlockSpec((1, ch_in, tm), lambda b, i: (b, 0, i)),
                pl.BlockSpec((ch_out, ch_in), lambda b, i: (0, 0)),
                pl.BlockSpec((ch_out, 1), lambda b, i: (0, 0)),
            ],
            out_specs=pl.BlockSpec((1, ch_out, tm), lambda b, i: (b, 0, i)),
        ),
        compiler_params=pltpu.CompilerParams(
            dimension_semantics=("parallel", "parallel")),
    )(y2, w_point, b_point.reshape(ch_out, 1))


# ----------------------------------------------------------------------------
# Forward + module wrapper (mirrors the PyTorch module).
# ----------------------------------------------------------------------------
def depthwise_separable_conv_forward(x, w_depth, b_depth, w_point, b_point, *,
                                     kernel_size, stride, padding=1):
    n, ch_in, h, w = x.shape
    ch_out = w_point.shape[0]
    k = kernel_size
    h_out = (h + 2 * padding - k) // stride + 1
    w_out = (w + 2 * padding - k) // stride + 1

    # Conv's own zero padding (tiny, semantically required).
    xp = jnp.pad(x, ((0, 0), (0, 0), (padding, padding), (padding, padding)))
    h1 = h + 2 * padding - k + 1   # stride-1 valid extent
    w1 = w + 2 * padding - k + 1

    # Depthwise stage (VPU).
    y1 = _depthwise_conv(xp, w_depth.reshape(-1), b_depth,
                         ch=ch_in, k=k, h1=h1, w1=w1)
    if stride != 1:
        y1 = y1[:, :, ::stride, ::stride]     # XLA subsample; no-op for stride=1

    # Pointwise 1x1 stage (MXU). Contiguous reshape -> lane-dense (ch, H*W).
    m = h_out * w_out
    y2 = y1.reshape(n, ch_in, m)
    out2 = _pointwise_conv(y2, w_point, b_point)
    return out2.reshape(n, ch_out, h_out, w_out)


class DepthwiseSeparableConv:
    """JAX/Pallas equivalent of the PyTorch depthwise_separable_conv."""

    def __init__(self, ch_in, ch_out, kernel_size, stride, *,
                 key=None, dtype=jnp.float32):
        self.ch_in, self.ch_out = ch_in, ch_out
        self.k, self.stride, self.padding = kernel_size, stride, 1
        if key is None:
            key = jax.random.PRNGKey(0)
        k1, k2, k3, k4 = jax.random.split(key, 4)
        bd = 1.0 / (kernel_size * kernel_size) ** 0.5   # depthwise fan_in = 1*k*k
        bp = 1.0 / ch_in ** 0.5                         # pointwise fan_in = ch_in
        self.w_depth = jax.random.uniform(k1, (ch_in, kernel_size, kernel_size),
                                          dtype, -bd, bd)
        self.b_depth = jax.random.uniform(k2, (ch_in,), dtype, -bd, bd)
        self.w_point = jax.random.uniform(k3, (ch_out, ch_in), dtype, -bp, bp)
        self.b_point = jax.random.uniform(k4, (ch_out,), dtype, -bp, bp)

    def __call__(self, x):
        return depthwise_separable_conv_forward(
            x, self.w_depth, self.b_depth, self.w_point, self.b_point,
            kernel_size=self.k, stride=self.stride, padding=self.padding)


if __name__ == "__main__":
    key = jax.random.PRNGKey(0)
    kx, kp = jax.random.split(key)

    N, C_IN, C_OUT, H, W = 2, 4, 8, 16, 16
    K, STRIDE = 3, 1

    x = jax.random.normal(kx, (N, C_IN, H, W), dtype=jnp.float32)
    module = DepthwiseSeparableConv(C_IN, C_OUT, K, STRIDE, key=kp)

    out = module(x)
    out = jax.block_until_ready(out)

    # Pure-JAX reference (lax convs, NCHW / OIHW).
    ref_d = lax.conv_general_dilated(
        x, module.w_depth.reshape(C_IN, 1, K, K),
        window_strides=(STRIDE, STRIDE), padding=((1, 1), (1, 1)),
        dimension_numbers=("NCHW", "OIHW", "NCHW"),
        feature_group_count=C_IN) + module.b_depth.reshape(1, C_IN, 1, 1)
    ref = lax.conv_general_dilated(
        ref_d, module.w_point.reshape(C_OUT, C_IN, 1, 1),
        window_strides=(1, 1), padding="VALID",
        dimension_numbers=("NCHW", "OIHW", "NCHW")) + module.b_point.reshape(1, C_OUT, 1, 1)

    assert out.shape == (N, C_OUT, H, W), out.shape
    assert out.dtype == x.dtype
    assert bool(jnp.allclose(out, ref, rtol=2e-2, atol=2e-2)), \
        "depthwise-separable conv mismatch vs lax reference"
    print("KERNEL_OK")
</pallas_src>

<mosaic_0001>
module attributes {stable_mosaic.version = 11 : i64} {
  func.func @_depthwise_kernel(%arg0: i32, %arg1: memref<1x4x18x18xf32, #tpu.memory_space<vmem>>, %arg2: memref<36xf32, #tpu.memory_space<smem>>, %arg3: memref<4xf32, #tpu.memory_space<smem>>, %arg4: memref<1x4x16x16xf32, #tpu.memory_space<vmem>>) attributes {dimension_semantics = [#tpu.dimension_semantics<parallel>], iteration_bounds = array<i64: 2>, scalar_prefetch = 0 : i64, scratch_operands = 0 : i64, tpu.core_type = #tpu.core_type<tc>, window_params = [{transform_indices = @transform_0, window_bounds = array<i64: 1, 4, 18, 18>}, {transform_indices = @transform_1, window_bounds = array<i64: 36>}, {transform_indices = @transform_2, window_bounds = array<i64: 4>}, {transform_indices = @transform_3, window_bounds = array<i64: 1, 4, 16, 16>}]} {
    %c0 = arith.constant 0 : index
    %c0_0 = arith.constant 0 : index
    %c0_1 = arith.constant 0 : index
    %c0_2 = arith.constant 0 : index
    %0 = vector.load %arg1[%c0, %c0_0, %c0_1, %c0_2] : memref<1x4x18x18xf32, #tpu.memory_space<vmem>>, vector<1x1x18x18xf32>
    %1 = vector.shape_cast %0 : vector<1x1x18x18xf32> to vector<18x18xf32>
    %cst = arith.constant 0.000000e+00 : f32
    %2 = vector.broadcast %cst : f32 to vector<16x16xf32>
    %c0_3 = arith.constant 0 : index
    %3 = memref.load %arg2[%c0_3] : memref<36xf32, #tpu.memory_space<smem>>
    %4 = vector.extract_strided_slice %1 {offsets = [0, 0], sizes = [16, 16], strides = [1, 1]} : vector<18x18xf32> to vector<16x16xf32>
    %5 = vector.broadcast %3 : f32 to vector<16x16xf32>
    %6 = arith.mulf %4, %5 : vector<16x16xf32>
    %7 = arith.addf %2, %6 : vector<16x16xf32>
    %c1 = arith.constant 1 : index
    %8 = memref.load %arg2[%c1] : memref<36xf32, #tpu.memory_space<smem>>
    %9 = vector.extract_strided_slice %1 {offsets = [0, 1], sizes = [16, 16], strides = [1, 1]} : vector<18x18xf32> to vector<16x16xf32>
    %10 = vector.broadcast %8 : f32 to vector<16x16xf32>
    %11 = arith.mulf %9, %10 : vector<16x16xf32>
    %12 = arith.addf %7, %11 : vector<16x16xf32>
    %c2 = arith.constant 2 : index
    %13 = memref.load %arg2[%c2] : memref<36xf32, #tpu.memory_space<smem>>
    %14 = vector.extract_strided_slice %1 {offsets = [0, 2], sizes = [16, 16], strides = [1, 1]} : vector<18x18xf32> to vector<16x16xf32>
    %15 = vector.broadcast %13 : f32 to vector<16x16xf32>
    %16 = arith.mulf %14, %15 : vector<16x16xf32>
    %17 = arith.addf %12, %16 : vector<16x16xf32>
    %c3 = arith.constant 3 : index
    %18 = memref.load %arg2[%c3] : memref<36xf32, #tpu.memory_space<smem>>
    %19 = vector.extract_strided_slice %1 {offsets = [1, 0], sizes = [16, 16], strides = [1, 1]} : vector<18x18xf32> to vector<16x16xf32>
    %20 = vector.broadcast %18 : f32 to vector<16x16xf32>
    %21 = arith.mulf %19, %20 : vector<16x16xf32>
    %22 = arith.addf %17, %21 : vector<16x16xf32>
    %c4 = arith.constant 4 : index
    %23 = memref.load %arg2[%c4] : memref<36xf32, #tpu.memory_space<smem>>
    %24 = vector.extract_strided_slice %1 {offsets = [1, 1], sizes = [16, 16], strides = [1, 1]} : vector<18x18xf32> to vector<16x16xf32>
    %25 = vector.broadcast %23 : f32 to vector<16x16xf32>
    %26 = arith.mulf %24, %25 : vector<16x16xf32>
    %27 = arith.addf %22, %26 : vector<16x16xf32>
    %c5 = arith.constant 5 : index
    %28 = memref.load %arg2[%c5] : memref<36xf32, #tpu.memory_space<smem>>
    %29 = vector.extract_strided_slice %1 {offsets = [1, 2], sizes = [16, 16], strides = [1, 1]} : vector<18x18xf32> to vector<16x16xf32>
    %30 = vector.broadcast %28 : f32 to vector<16x16xf32>
    %31 = arith.mulf %29, %30 : vector<16x16xf32>
    %32 = arith.addf %27, %31 : vector<16x16xf32>
    %c6 = arith.constant 6 : index
    %33 = memref.load %arg2[%c6] : memref<36xf32, #tpu.memory_space<smem>>
    %34 = vector.extract_strided_slice %1 {offsets = [2, 0], sizes = [16, 16], strides = [1, 1]} : vector<18x18xf32> to vector<16x16xf32>
    %35 = vector.broadcast %33 : f32 to vector<16x16xf32>
    %36 = arith.mulf %34, %35 : vector<16x16xf32>
    %37 = arith.addf %32, %36 : vector<16x16xf32>
    %c7 = arith.constant 7 : index
    %38 = memref.load %arg2[%c7] : memref<36xf32, #tpu.memory_space<smem>>
    %39 = vector.extract_strided_slice %1 {offsets = [2, 1], sizes = [16, 16], strides = [1, 1]} : vector<18x18xf32> to vector<16x16xf32>
    %40 = vector.broadcast %38 : f32 to vector<16x16xf32>
    %41 = arith.mulf %39, %40 : vector<16x16xf32>
    %42 = arith.addf %37, %41 : vector<16x16xf32>
    %c8 = arith.constant 8 : index
    %43 = memref.load %arg2[%c8] : memref<36xf32, #tpu.memory_space<smem>>
    %44 = vector.extract_strided_slice %1 {offsets = [2, 2], sizes = [16, 16], strides = [1, 1]} : vector<18x18xf32> to vector<16x16xf32>
    %45 = vector.broadcast %43 : f32 to vector<16x16xf32>
    %46 = arith.mulf %44, %45 : vector<16x16xf32>
    %47 = arith.addf %42, %46 : vector<16x16xf32>
    %c0_4 = arith.constant 0 : index
    %48 = memref.load %arg3[%c0_4] : memref<4xf32, #tpu.memory_space<smem>>
    %49 = vector.broadcast %48 : f32 to vector<16x16xf32>
    %50 = arith.addf %47, %49 : vector<16x16xf32>
    %c0_5 = arith.constant 0 : index
    %c0_6 = arith.constant 0 : index
    %c0_7 = arith.constant 0 : index
    %c0_8 = arith.constant 0 : index
    %51 = vector.load %arg4[%c0_5, %c0_6, %c0_7, %c0_8] : memref<1x4x16x16xf32, #tpu.memory_space<vmem>>, vector<1x1x16x16xf32>
    %52 = vector.shape_cast %51 : vector<1x1x16x16xf32> to vector<16x16xf32>
    %53 = vector.shape_cast %50 : vector<16x16xf32> to vector<1x1x16x16xf32>
    tpu.vector_store %arg4[%c0_5, %c0_6, %c0_7, %c0_8], %53 {strides = array<i32>} : memref<1x4x16x16xf32, #tpu.memory_space<vmem>>, vector<1x1x16x16xf32>,
    %c0_9 = arith.constant 0 : index
    %c1_10 = arith.constant 1 : index
    %c0_11 = arith.constant 0 : index
    %c0_12 = arith.constant 0 : index
    %54 = vector.load %arg1[%c0_9, %c1_10, %c0_11, %c0_12] : memref<1x4x18x18xf32, #tpu.memory_space<vmem>>, vector<1x1x18x18xf32>
    %55 = vector.shape_cast %54 : vector<1x1x18x18xf32> to vector<18x18xf32>
    %cst_13 = arith.constant 0.000000e+00 : f32
    %56 = vector.broadcast %cst_13 : f32 to vector<16x16xf32>
    %c9 = arith.constant 9 : index
    %57 = memref.load %arg2[%c9] : memref<36xf32, #tpu.memory_space<smem>>
    %58 = vector.extract_strided_slice %55 {offsets = [0, 0], sizes = [16, 16], strides = [1, 1]} : vector<18x18xf32> to vector<16x16xf32>
    %59 = vector.broadcast %57 : f32 to vector<16x16xf32>
    %60 = arith.mulf %58, %59 : vector<16x16xf32>
    %61 = arith.addf %56, %60 : vector<16x16xf32>
    %c10 = arith.constant 10 : index
    %62 = memref.load %arg2[%c10] : memref<36xf32, #tpu.memory_space<smem>>
    %63 = vector.extract_strided_slice %55 {offsets = [0, 1], sizes = [16, 16], strides = [1, 1]} : vector<18x18xf32> to vector<16x16xf32>
    %64 = vector.broadcast %62 : f32 to vector<16x16xf32>
    %65 = arith.mulf %63, %64 : vector<16x16xf32>
    %66 = arith.addf %61, %65 : vector<16x16xf32>
    %c11 = arith.constant 11 : index
    %67 = memref.load %arg2[%c11] : memref<36xf32, #tpu.memory_space<smem>>
    %68 = vector.extract_strided_slice %55 {offsets = [0, 2], sizes = [16, 16], strides = [1, 1]} : vector<18x18xf32> to vector<16x16xf32>
    %69 = vector.broadcast %67 : f32 to vector<16x16xf32>
    %70 = arith.mulf %68, %69 : vector<16x16xf32>
    %71 = arith.addf %66, %70 : vector<16x16xf32>
    %c12 = arith.constant 12 : index
    %72 = memref.load %arg2[%c12] : memref<36xf32, #tpu.memory_space<smem>>
    %73 = vector.extract_strided_slice %55 {offsets = [1, 0], sizes = [16, 16], strides = [1, 1]} : vector<18x18xf32> to vector<16x16xf32>
    %74 = vector.broadcast %72 : f32 to vector<16x16xf32>
    %75 = arith.mulf %73, %74 : vector<16x16xf32>
    %76 = arith.addf %71, %75 : vector<16x16xf32>
    %c13 = arith.constant 13 : index
    %77 = memref.load %arg2[%c13] : memref<36xf32, #tpu.memory_space<smem>>
    %78 = vector.extract_strided_slice %55 {offsets = [1, 1], sizes = [16, 16], strides = [1, 1]} : vector<18x18xf32> to vector<16x16xf32>
    %79 = vector.broadcast %77 : f32 to vector<16x16xf32>
    %80 = arith.mulf %78, %79 : vector<16x16xf32>
    %81 = arith.addf %76, %80 : vector<16x16xf32>
    %c14 = arith.constant 14 : index
    %82 = memref.load %arg2[%c14] : memref<36xf32, #tpu.memory_space<smem>>
    %83 = vector.extract_strided_slice %55 {offsets = [1, 2], sizes = [16, 16], strides = [1, 1]} : vector<18x18xf32> to vector<16x16xf32>
    %84 = vector.broadcast %82 : f32 to vector<16x16xf32>
    %85 = arith.mulf %83, %84 : vector<16x16xf32>
    %86 = arith.addf %81, %85 : vector<16x16xf32>
    %c15 = arith.constant 15 : index
    %87 = memref.load %arg2[%c15] : memref<36xf32, #tpu.memory_space<smem>>
    %88 = vector.extract_strided_slice %55 {offsets = [2, 0], sizes = [16, 16], strides = [1, 1]} : vector<18x18xf32> to vector<16x16xf32>
    %89 = vector.broadcast %87 : f32 to vector<16x16xf32>
    %90 = arith.mulf %88, %89 : vector<16x16xf32>
    %91 = arith.addf %86, %90 : vector<16x16xf32>
    %c16 = arith.constant 16 : index
    %92 = memref.load %arg2[%c16] : memref<36xf32, #tpu.memory_space<smem>>
    %93 = vector.extract_strided_slice %55 {offsets = [2, 1], sizes = [16, 16], strides = [1, 1]} : vector<18x18xf32> to vector<16x16xf32>
    %94 = vector.broadcast %92 : f32 to vector<16x16xf32>
    %95 = arith.mulf %93, %94 : vector<16x16xf32>
    %96 = arith.addf %91, %95 : vector<16x16xf32>
    %c17 = arith.constant 17 : index
    %97 = memref.load %arg2[%c17] : memref<36xf32, #tpu.memory_space<smem>>
    %98 = vector.extract_strided_slice %55 {offsets = [2, 2], sizes = [16, 16], strides = [1, 1]} : vector<18x18xf32> to vector<16x16xf32>
    %99 = vector.broadcast %97 : f32 to vector<16x16xf32>
    %100 = arith.mulf %98, %99 : vector<16x16xf32>
    %101 = arith.addf %96, %100 : vector<16x16xf32>
    %c1_14 = arith.constant 1 : index
    %102 = memref.load %arg3[%c1_14] : memref<4xf32, #tpu.memory_space<smem>>
    %103 = vector.broadcast %102 : f32 to vector<16x16xf32>
    %104 = arith.addf %101, %103 : vector<16x16xf32>
    %c0_15 = arith.constant 0 : index
    %c1_16 = arith.constant 1 : index
    %c0_17 = arith.constant 0 : index
    %c0_18 = arith.constant 0 : index
    %105 = vector.load %arg4[%c0_15, %c1_16, %c0_17, %c0_18] : memref<1x4x16x16xf32, #tpu.memory_space<vmem>>, vector<1x1x16x16xf32>
    %106 = vector.shape_cast %105 : vector<1x1x16x16xf32> to vector<16x16xf32>
    %107 = vector.shape_cast %104 : vector<16x16xf32> to vector<1x1x16x16xf32>
    tpu.vector_store %arg4[%c0_15, %c1_16, %c0_17, %c0_18], %107 {strides = array<i32>} : memref<1x4x16x16xf32, #tpu.memory_space<vmem>>, vector<1x1x16x16xf32>,
    %c0_19 = arith.constant 0 : index
    %c2_20 = arith.constant 2 : index
    %c0_21 = arith.constant 0 : index
    %c0_22 = arith.constant 0 : index
    %108 = vector.load %arg1[%c0_19, %c2_20, %c0_21, %c0_22] : memref<1x4x18x18xf32, #tpu.memory_space<vmem>>, vector<1x1x18x18xf32>
    %109 = vector.shape_cast %108 : vector<1x1x18x18xf32> to vector<18x18xf32>
    %cst_23 = arith.constant 0.000000e+00 : f32
    %110 = vector.broadcast %cst_23 : f32 to vector<16x16xf32>
    %c18 = arith.constant 18 : index
    %111 = memref.load %arg2[%c18] : memref<36xf32, #tpu.memory_space<smem>>
    %112 = vector.extract_strided_slice %109 {offsets = [0, 0], sizes = [16, 16], strides = [1, 1]} : vector<18x18xf32> to vector<16x16xf32>
    %113 = vector.broadcast %111 : f32 to vector<16x16xf32>
    %114 = arith.mulf %112, %113 : vector<16x16xf32>
    %115 = arith.addf %110, %114 : vector<16x16xf32>
    %c19 = arith.constant 19 : index
    %116 = memref.load %arg2[%c19] : memref<36xf32, #tpu.memory_space<smem>>
    %117 = vector.extract_strided_slice %109 {offsets = [0, 1], sizes = [16, 16], strides = [1, 1]} : vector<18x18xf32> to vector<16x16xf32>
    %118 = vector.broadcast %116 : f32 to vector<16x16xf32>
    %119 = arith.mulf %117, %118 : vector<16x16xf32>
    %120 = arith.addf %115, %119 : vector<16x16xf32>
    %c20 = arith.constant 20 : index
    %121 = memref.load %arg2[%c20] : memref<36xf32, #tpu.memory_space<smem>>
    %122 = vector.extract_strided_slice %109 {offsets = [0, 2], sizes = [16, 16], strides = [1, 1]} : vector<18x18xf32> to vector<16x16xf32>
    %123 = vector.broadcast %121 : f32 to vector<16x16xf32>
    %124 = arith.mulf %122, %123 : vector<16x16xf32>
    %125 = arith.addf %120, %124 : vector<16x16xf32>
    %c21 = arith.constant 21 : index
    %126 = memref.load %arg2[%c21] : memref<36xf32, #tpu.memory_space<smem>>
    %127 = vector.extract_strided_slice %109 {offsets = [1, 0], sizes = [16, 16], strides = [1, 1]} : vector<18x18xf32> to vector<16x16xf32>
    %128 = vector.broadcast %126 : f32 to vector<16x16xf32>
    %129 = arith.mulf %127, %128 : vector<16x16xf32>
    %130 = arith.addf %125, %129 : vector<16x16xf32>
    %c22 = arith.constant 22 : index
    %131 = memref.load %arg2[%c22] : memref<36xf32, #tpu.memory_space<smem>>
    %132 = vector.extract_strided_slice %109 {offsets = [1, 1], sizes = [16, 16], strides = [1, 1]} : vector<18x18xf32> to vector<16x16xf32>
    %133 = vector.broadcast %131 : f32 to vector<16x16xf32>
    %134 = arith.mulf %132, %133 : vector<16x16xf32>
    %135 = arith.addf %130, %134 : vector<16x16xf32>
    %c23 = arith.constant 23 : index
    %136 = memref.load %arg2[%c23] : memref<36xf32, #tpu.memory_space<smem>>
    %137 = vector.extract_strided_slice %109 {offsets = [1, 2], sizes = [16, 16], strides = [1, 1]} : vector<18x18xf32> to vector<16x16xf32>
    %138 = vector.broadcast %136 : f32 to vector<16x16xf32>
    %139 = arith.mulf %137, %138 : vector<16x16xf32>
    %140 = arith.addf %135, %139 : vector<16x16xf32>
    %c24 = arith.constant 24 : index
    %141 = memref.load %arg2[%c24] : memref<36xf32, #tpu.memory_space<smem>>
    %142 = vector.extract_strided_slice %109 {offsets = [2, 0], sizes = [16, 16], strides = [1, 1]} : vector<18x18xf32> to vector<16x16xf32>
    %143 = vector.broadcast %141 : f32 to vector<16x16xf32>
    %144 = arith.mulf %142, %143 : vector<16x16xf32>
    %145 = arith.addf %140, %144 : vector<16x16xf32>
    %c25 = arith.constant 25 : index
    %146 = memref.load %arg2[%c25] : memref<36xf32, #tpu.memory_space<smem>>
    %147 = vector.extract_strided_slice %109 {offsets = [2, 1], sizes = [16, 16], strides = [1, 1]} : vector<18x18xf32> to vector<16x16xf32>
    %148 = vector.broadcast %146 : f32 to vector<16x16xf32>
    %149 = arith.mulf %147, %148 : vector<16x16xf32>
    %150 = arith.addf %145, %149 : vector<16x16xf32>
    %c26 = arith.constant 26 : index
    %151 = memref.load %arg2[%c26] : memref<36xf32, #tpu.memory_space<smem>>
    %152 = vector.extract_strided_slice %109 {offsets = [2, 2], sizes = [16, 16], strides = [1, 1]} : vector<18x18xf32> to vector<16x16xf32>
    %153 = vector.broadcast %151 : f32 to vector<16x16xf32>
    %154 = arith.mulf %152, %153 : vector<16x16xf32>
    %155 = arith.addf %150, %154 : vector<16x16xf32>
    %c2_24 = arith.constant 2 : index
    %156 = memref.load %arg3[%c2_24] : memref<4xf32, #tpu.memory_space<smem>>
    %157 = vector.broadcast %156 : f32 to vector<16x16xf32>
    %158 = arith.addf %155, %157 : vector<16x16xf32>
    %c0_25 = arith.constant 0 : index
    %c2_26 = arith.constant 2 : index
    %c0_27 = arith.constant 0 : index
    %c0_28 = arith.constant 0 : index
    %159 = vector.load %arg4[%c0_25, %c2_26, %c0_27, %c0_28] : memref<1x4x16x16xf32, #tpu.memory_space<vmem>>, vector<1x1x16x16xf32>
    %160 = vector.shape_cast %159 : vector<1x1x16x16xf32> to vector<16x16xf32>
    %161 = vector.shape_cast %158 : vector<16x16xf32> to vector<1x1x16x16xf32>
    tpu.vector_store %arg4[%c0_25, %c2_26, %c0_27, %c0_28], %161 {strides = array<i32>} : memref<1x4x16x16xf32, #tpu.memory_space<vmem>>, vector<1x1x16x16xf32>,
    %c0_29 = arith.constant 0 : index
    %c3_30 = arith.constant 3 : index
    %c0_31 = arith.constant 0 : index
    %c0_32 = arith.constant 0 : index
    %162 = vector.load %arg1[%c0_29, %c3_30, %c0_31, %c0_32] : memref<1x4x18x18xf32, #tpu.memory_space<vmem>>, vector<1x1x18x18xf32>
    %163 = vector.shape_cast %162 : vector<1x1x18x18xf32> to vector<18x18xf32>
    %cst_33 = arith.constant 0.000000e+00 : f32
    %164 = vector.broadcast %cst_33 : f32 to vector<16x16xf32>
    %c27 = arith.constant 27 : index
    %165 = memref.load %arg2[%c27] : memref<36xf32, #tpu.memory_space<smem>>
    %166 = vector.extract_strided_slice %163 {offsets = [0, 0], sizes = [16, 16], strides = [1, 1]} : vector<18x18xf32> to vector<16x16xf32>
    %167 = vector.broadcast %165 : f32 to vector<16x16xf32>
    %168 = arith.mulf %166, %167 : vector<16x16xf32>
    %169 = arith.addf %164, %168 : vector<16x16xf32>
    %c28 = arith.constant 28 : index
    %170 = memref.load %arg2[%c28] : memref<36xf32, #tpu.memory_space<smem>>
    %171 = vector.extract_strided_slice %163 {offsets = [0, 1], sizes = [16, 16], strides = [1, 1]} : vector<18x18xf32> to vector<16x16xf32>
    %172 = vector.broadcast %170 : f32 to vector<16x16xf32>
    %173 = arith.mulf %171, %172 : vector<16x16xf32>
    %174 = arith.addf %169, %173 : vector<16x16xf32>
    %c29 = arith.constant 29 : index
    %175 = memref.load %arg2[%c29] : memref<36xf32, #tpu.memory_space<smem>>
    %176 = vector.extract_strided_slice %163 {offsets = [0, 2], sizes = [16, 16], strides = [1, 1]} : vector<18x18xf32> to vector<16x16xf32>
    %177 = vector.broadcast %175 : f32 to vector<16x16xf32>
    %178 = arith.mulf %176, %177 : vector<16x16xf32>
    %179 = arith.addf %174, %178 : vector<16x16xf32>
    %c30 = arith.constant 30 : index
    %180 = memref.load %arg2[%c30] : memref<36xf32, #tpu.memory_space<smem>>
    %181 = vector.extract_strided_slice %163 {offsets = [1, 0], sizes = [16, 16], strides = [1, 1]} : vector<18x18xf32> to vector<16x16xf32>
    %182 = vector.broadcast %180 : f32 to vector<16x16xf32>
    %183 = arith.mulf %181, %182 : vector<16x16xf32>
    %184 = arith.addf %179, %183 : vector<16x16xf32>
    %c31 = arith.constant 31 : index
    %185 = memref.load %arg2[%c31] : memref<36xf32, #tpu.memory_space<smem>>
    %186 = vector.extract_strided_slice %163 {offsets = [1, 1], sizes = [16, 16], strides = [1, 1]} : vector<18x18xf32> to vector<16x16xf32>
    %187 = vector.broadcast %185 : f32 to vector<16x16xf32>
    %188 = arith.mulf %186, %187 : vector<16x16xf32>
    %189 = arith.addf %184, %188 : vector<16x16xf32>
    %c32 = arith.constant 32 : index
    %190 = memref.load %arg2[%c32] : memref<36xf32, #tpu.memory_space<smem>>
    %191 = vector.extract_strided_slice %163 {offsets = [1, 2], sizes = [16, 16], strides = [1, 1]} : vector<18x18xf32> to vector<16x16xf32>
    %192 = vector.broadcast %190 : f32 to vector<16x16xf32>
    %193 = arith.mulf %191, %192 : vector<16x16xf32>
    %194 = arith.addf %189, %193 : vector<16x16xf32>
    %c33 = arith.constant 33 : index
    %195 = memref.load %arg2[%c33] : memref<36xf32, #tpu.memory_space<smem>>
    %196 = vector.extract_strided_slice %163 {offsets = [2, 0], sizes = [16, 16], strides = [1, 1]} : vector<18x18xf32> to vector<16x16xf32>
    %197 = vector.broadcast %195 : f32 to vector<16x16xf32>
    %198 = arith.mulf %196, %197 : vector<16x16xf32>
    %199 = arith.addf %194, %198 : vector<16x16xf32>
    %c34 = arith.constant 34 : index
    %200 = memref.load %arg2[%c34] : memref<36xf32, #tpu.memory_space<smem>>
    %201 = vector.extract_strided_slice %163 {offsets = [2, 1], sizes = [16, 16], strides = [1, 1]} : vector<18x18xf32> to vector<16x16xf32>
    %202 = vector.broadcast %200 : f32 to vector<16x16xf32>
    %203 = arith.mulf %201, %202 : vector<16x16xf32>
    %204 = arith.addf %199, %203 : vector<16x16xf32>
    %c35 = arith.constant 35 : index
    %205 = memref.load %arg2[%c35] : memref<36xf32, #tpu.memory_space<smem>>
    %206 = vector.extract_strided_slice %163 {offsets = [2, 2], sizes = [16, 16], strides = [1, 1]} : vector<18x18xf32> to vector<16x16xf32>
    %207 = vector.broadcast %205 : f32 to vector<16x16xf32>
    %208 = arith.mulf %206, %207 : vector<16x16xf32>
    %209 = arith.addf %204, %208 : vector<16x16xf32>
    %c3_34 = arith.constant 3 : index
    %210 = memref.load %arg3[%c3_34] : memref<4xf32, #tpu.memory_space<smem>>
    %211 = vector.broadcast %210 : f32 to vector<16x16xf32>
    %212 = arith.addf %209, %211 : vector<16x16xf32>
    %c0_35 = arith.constant 0 : index
    %c3_36 = arith.constant 3 : index
    %c0_37 = arith.constant 0 : index
    %c0_38 = arith.constant 0 : index
    %213 = vector.load %arg4[%c0_35, %c3_36, %c0_37, %c0_38] : memref<1x4x16x16xf32, #tpu.memory_space<vmem>>, vector<1x1x16x16xf32>
    %214 = vector.shape_cast %213 : vector<1x1x16x16xf32> to vector<16x16xf32>
    %215 = vector.shape_cast %212 : vector<16x16xf32> to vector<1x1x16x16xf32>
    tpu.vector_store %arg4[%c0_35, %c3_36, %c0_37, %c0_38], %215 {strides = array<i32>} : memref<1x4x16x16xf32, #tpu.memory_space<vmem>>, vector<1x1x16x16xf32>,
    return
  }
  func.func @transform_0(%arg0: i32) -> (i32, i32, i32, i32) {
    %c0_i32 = arith.constant 0 : i32
    %c0_i32_0 = arith.constant 0 : i32
    %c0_i32_1 = arith.constant 0 : i32
    %c0_i32_2 = arith.constant 0 : i32
    return %arg0, %c0_i32, %c0_i32_0, %c0_i32_1 : i32, i32, i32, i32
  }
  func.func @transform_1(%arg0: i32) -> i32 {
    %c0_i32 = arith.constant 0 : i32
    %c0_i32_0 = arith.constant 0 : i32
    return %c0_i32 : i32
  }
  func.func @transform_2(%arg0: i32) -> i32 {
    %c0_i32 = arith.constant 0 : i32
    %c0_i32_0 = arith.constant 0 : i32
    return %c0_i32 : i32
  }
  func.func @transform_3(%arg0: i32) -> (i32, i32, i32, i32) {
    %c0_i32 = arith.constant 0 : i32
    %c0_i32_0 = arith.constant 0 : i32
    %c0_i32_1 = arith.constant 0 : i32
    %c0_i32_2 = arith.constant 0 : i32
    return %arg0, %c0_i32, %c0_i32_0, %c0_i32_1 : i32, i32, i32, i32
  }
}

</mosaic_0001>

<bundles_post_ra>
// kernel: tpu_custom_call.1
= control target key start
LH: loop header
LB: loop body
LE: loop exit
PB: predicated region body
PF: predicated region fallthrough
CT: control target
= control target key end

     0   :  { %8 = vsyncpa [#allocation4], 0  ;;  %s1783_s0 = inlined_call_operand.vmem [shape: f32[2,4,18,18], index: 0, kind: input, shape index: {}]   ;;  %s1784_s1 = inlined_call_operand.vmem [shape: f32[36], index: 1, kind: input, shape index: {}]   ;;  %s1785_s2 = inlined_call_operand.vmem [shape: f32[4], index: 2, kind: input, shape index: {}]   ;;  %s1786_s3 = inlined_call_operand.hbm [shape: f32[2,4,16,16], index: 3, kind: output, shape index: {}]  }
   0x1   :  { %9 = vsyncpa [#allocation6], 0 }
   0x2   :  { %10 = vsyncpa [#allocation3], 0 }
   0x3   :  { %12 = vsyncpa [#allocation3 + $0x1], 0  ;;  %s1208_s12 = smov 0   ;;  %s1210_s13 = smov 0  }
   0x4   :  { %s1212_s14 = smov 0   ;;  %s1214_s15 = smov 0  }
   0x5 LB: > { %s1229_s16 = sadd.s32 4294967295, %s1179_s15   ;;  %s947_s17 = sadd.s32 4294967294, %s1179_s15   ;;  %s1179_s15 = sphi %s1214_s15, %s1804_s15   ;;  %s1175_s14 = sphi %s1212_s14, %s1803_s14   ;;  %s1171_s13 = sphi %s1210_s13, %s1802_s13   ;;  %s1167_s12 = sphi %s1208_s12, %s1801_s12  }
   0x6   : > { %s1233_s18 = sadd.s32 1, %s1179_s15   ;;  %s93_s19 = sadd.s32 1, %s1175_s14 }
   0x7   : > { %s90_s20 = ssub.s32 %s1179_s15, %s1233_s18  ;;  %p103_p0 = scmp.ne.s32.totalorder %s1175_s14, %s1171_s13 }
   0x8   : > { %p91_p1 = scmp.eq.s32.totalorder %s90_s20, 0  ;;  %p104_p2 = scmp.eq.s32.totalorder %s1229_s16, 1 }
   0x9   : > { %p109_p3 = scmp.ne.s32.totalorder %s1171_s13, %s1167_s12  ;;  %p110_p4 = scmp.eq.s32.totalorder %s947_s17, 1 }
   0xa   : > { %s1244_s21 = scalar_select %p91_p1, %s1175_s14, %s93_s19  }
   0xb   : > { %p1246_p5 = por %p104_p2, %p103_p0  ;;  %p1250_p6 = por %p110_p4, %p109_p3 }
   0xc   : > { %p948_p7 = scmp.ge.s32.totalorder %s1179_s15, 1  ;;  %p117_p8 = scmp.lt.s32.totalorder %s1179_s15, 3 }
   0xd   : > { %s1790_s22 = scalar_select %p1246_p5, 1, 0 }
   0xe   : > { %s1791_s23 = scalar_select %p1250_p6, 1, 0 }
   0xf   : > { %p1787_p9 = scmp.eq.s32.totalorder %s1229_s16, 0  ;;  %p1257_p10 = pnand %p948_p7, %p117_p8 }
  0x10   : > { %s130_s27 = sshll.u32 %s1784_s1, 4  ;;  %s141_s30 = sshll.u32 %s1785_s2, 4  ;;  %s131_s27 = int_to_ptr.vmem [resolvable:$true] %s130_s27  ;;  %s142_s30 = int_to_ptr.vmem [resolvable:$true] %s141_s30 }
  0x11   : > { %s1792_s24 = scalar_select %p1257_p10, 1, 0 }
  0x12   : > { %p1027_p11 = pneg %p1257_p10  ;;  %s1081_s5 = scalar_lea.vmem %s131_s27, 16 }
  0x13   : > { %p1082_p13 = scmp.ne.s32.totalorder %s131_s27, %s1081_s5  ;;  %p1089_p3 = scmp.lt.s32.totalorder %s131_s27, %s131_s27 }
  0x14   : > { %p1271_p12 = pnand %p1787_p9, %p1027_p11  ;;  %p1090_p4 = scmp.lt.s32.totalorder %s1081_s5, %s1081_s5 }
  0x16   : > { %p1083_p0 = pneg %p1271_p12  ;;  %p1091_p7 = por %p1090_p4, %p1089_p3 }
  0x18   : > { %p1084_p1 = pnand %p1083_p0, %p1082_p13 }
  0x1a   : > { %p1085_p2 = pneg %p1084_p1 }
  0x1c   : > { %p1092_p8 = pnand %p1091_p7, %p1085_p2 }
  0x1e   : > { %1095 = shalt.err (!%p1092_p8)
}
  0x1f   : > { %s1181_s6 = smov [#allocation2]   ;;  %s1096_s7 = scalar_lea.vmem %s142_s30, 16 }
  0x20   : > { %1030 = dma.vmem_to_smem (!%p1271_p12), %s131_s27, 16, %s1181_s6, [#allocation4]  }
  0x21   : > { %p1097_p11 = scmp.ne.s32.totalorder %s142_s30, %s1096_s7  ;;  %p1104_p5 = scmp.lt.s32.totalorder %s142_s30, %s142_s30 }
  0x22   : > { %p1105_p10 = scmp.lt.s32.totalorder %s1096_s7, %s1096_s7 }
  0x23   : > { %p1099_p9 = pnand %p1097_p11, %p1083_p0 }
  0x24   : > { %p1106_p13 = por %p1105_p10, %p1104_p5 }
  0x25   : > { %p1100_p6 = pneg %p1099_p9 }
  0x27   : > { %p1107_p1 = pnand %p1106_p13, %p1100_p6 }
  0x29   : > { %1110 = shalt.err (!%p1107_p1)
}
  0x2a   : > { %s1182_s8 = smov [#allocation5]   ;;  %p1794_p2 = scmp.ne.s32.totalorder %s1792_s24, 0 }
  0x2b   : > { %1033 = dma.vmem_to_smem (!%p1271_p12), %s142_s30, 16, %s1182_s8, [#allocation6]  }
  0x2c   : > { %162 = sbr.rel (%p1794_p2) target bundleno = 291 (0x123), region = 32  ;;  %p1795_p3 = scmp.eq.s32.totalorder (!%p1794_p2), %s1229_s16, 0 }
  0x31   : > { %1154 = dma.done.wait (%p1795_p3), [#allocation4], 16   ;;  %p1796_p4 = pmov %p1795_p3 }
  0x32   : > { %p1797_p9 = pmov %p1795_p3 }
  0x33   : > { %1156 = vsyncadd (%p1796_p4), [#allocation4], 4294967280 }
  0x34   : > { %1158 = dma.done.wait (%p1797_p9), [#allocation6], 16   ;;  %p1798_p5 = pmov %p1795_p3 }
  0x36   : > { %1160 = vsyncadd (%p1798_p5), [#allocation6], 4294967280 }
  0x37   : > { %172 = sfence }
  0x38   : > { %p191_p6 = scmp.lt.s32.totalorder %s1229_s16, 1  ;;  %s958_s9 = sld [smem:[#allocation2 + $0x2]]  ;;  %vm241_vm0 = vcmask 1046528   ;;  %vm301_vm1 = vcmask 1045504   ;;  %vm357_vm2 = vcmask 130048  }
  0x39   : > { %s957_s10 = sld [smem:[#allocation2 + $0x1]]  ;;  %s1183_s28 = smov 126  }
  0x3a   : > { %s192_s11 = scalar_select %p191_p6, %s1229_s16, 1 }
  0x3b   : > { %s960_s17 = sld [smem:[#allocation2 + $0x4]]  ;;  %s1184_s29 = smov 127  }
  0x3c   : > { %s1016_s19 = smul.u32 96, %s192_s11  ;;  %s961_s20 = sld [smem:[#allocation2 + $0x5]] }
  0x3d   : > { %s963_s24 = sld [smem:[#allocation2 + $0x7]]  ;;  %p1799_p12 = scmp.ne.s32.totalorder %s1790_s22, 0 }
  0x3e   : > { %s1296_s27 = scalar_lea.vmem %s1783_s0, %s1016_s19  ;;  %v220_v0 = vstv %s958_s9  ;;  %s969_s30 = sld [smem:[#allocation2 + $0xa]] }
  0x3f   : > { %v1299_v1 = vld [vmem:[%s1296_s27] sm:$0xff]  ;;  %v1302_v2 = vld [vmem:[%s1296_s27 + $0x8] sm:$0xff]  ;;  %v206_v3 = vstv %s957_s10  ;;  %v1305_v4 = vld [vmem:[%s1296_s27 + $0x10] sm:$0x3]  ;;  %s984_s4 = sld [smem:[#allocation2 + $0x13]] }
  0x40   : > { %v221_v5 = vmul.f32 %v220_v0, %v1299_v1  ;;  %v207_v6 = vmul.f32 %v206_v3, %v1299_v1  ;;  %v222_v7 = vmul.f32 %v220_v0, %v1302_v2  ;;  %v208_v8 = vmul.f32 %v206_v3, %v1302_v2  ;;  %s1330_s5 = sld [smem:[#allocation2 + $0x1c]]  ;;  %v1339_v36 = vld [vmem:[%s1296_s27 + $0x20] sm:$0xff]  ;;  %v1342_v38 = vld [vmem:[%s1296_s27 + $0x18] sm:$0xff]  ;;  %v1356_v43 = vld [vmem:[%s1296_s27 + $0x30] sm:$0xff] }
  0x41   : > { %v252_v9 = vstv %s960_s17  ;;  %s1334_s6 = sld [smem:[#allocation2 + $0xb]]  ;;  %v1353_v41 = vld [vmem:[%s1296_s27 + $0x38] sm:$0xff]  ;;  %v1369_v46 = vld [vmem:[%s1296_s27 + $0x50] sm:$0xff]  ;;  %v1373_v48 = vld [vmem:[%s1296_s27 + $0x48] sm:$0xff] }
  0x42   : > { %225 = vrot.lane.b32.xlu1 %v221_v5, %s1183_s28  ;;  %211 = vrot.lane.b32.xlu0 %v207_v6, %s1184_s29  ;;  %v254_v10 = vmul.f32 %v252_v9, %v1302_v2  ;;  %v255_v11 = vmul.f32 %v252_v9, %v1305_v4  ;;  %v253_v12 = vmul.f32 %v252_v9, %v1299_v1  ;;  %v273_v13 = vstv %s961_s20  ;;  %s1344_s7 = sld [smem:[#allocation2 + $0x14]]  ;;  %v1377_v50 = vld [vmem:[%s1296_s27 + $0x28] sm:$0x3] }
  0x43   : > { %v275_v14 = vmul.f32 %v273_v13, %v1302_v2  ;;  %v276_v15 = vmul.f32 %v273_v13, %v1305_v4  ;;  %v274_v16 = vmul.f32 %v273_v13, %v1299_v1  ;;  %v312_v17 = vstv %s963_s24  ;;  %s972_s8 = sld [smem:[#allocation2 + $0xd]]  ;;  %v1392_v61 = vld [vmem:[%s1296_s27 + $0x40] sm:$0x3]  ;;  %v1401_v6 = vld [vmem:[%s1296_s27 + $0x58] sm:$0x3] }
  0x44   : > { %v260_v18 = vrot.slane %v254_v10, 1  ;;  %v262_v19 = vrot.slane %v255_v11, 1  ;;  %v259_v20 = vrot.slane %v253_v12, 1  ;;  %v314_v24 = vmul.f32 %v312_v17, %v1302_v2  ;;  %s987_s9 = sld [smem:[#allocation2 + $0x16]] }
  0x45   : > { %v281_v21 = vrot.slane %v275_v14, 1  ;;  %v283_v22 = vrot.slane %v276_v15, 1  ;;  %v280_v23 = vrot.slane %v274_v16, 1  ;;  %v315_v27 = vmul.f32 %v312_v17, %v1305_v4  ;;  %s1350_s10 = sld [smem:[#allocation2 + $0x1d]] }
  0x46   : > { %227 = vrot.lane.b32.xlu1 %v222_v7, %s1183_s28  ;;  %213 = vrot.lane.b32.xlu0 %v208_v8, %s1184_s29  ;;  %v263_v25 = vsel %vm241_vm0, %v260_v18, %v262_v19  ;;  %v261_v26 = vsel %vm241_vm0, %v259_v20, %v260_v18  ;;  %v313_v28 = vmul.f32 %v312_v17, %v1299_v1  ;;  %v320_v29 = vrot.slane %v314_v24, 2  ;;  %s1002_s11 = sld [smem:[#allocation2 + $0x1f]] }
  0x47   : > { %v284_v30 = vsel %vm241_vm0, %v281_v21, %v283_v22  ;;  %v282_v31 = vsel %vm241_vm0, %v280_v23, %v281_v21  ;;  %v322_v32 = vrot.slane %v315_v27, 2  ;;  %v371_v37 = vstv %s969_s30  ;;  %s1358_s17 = sld [smem:[#allocation2 + $0xe]] }
  0x48   : > { %v319_v33 = vrot.slane %v313_v28, 2  ;;  %v373_v39 = vmul.f32 %v1339_v36, %v371_v37  ;;  %v372_v40 = vmul.f32 %v1342_v38, %v371_v37  ;;  %v534_v42 = vstv %s984_s4  ;;  %s1360_s19 = sld [smem:[#allocation2 + $0x8]] }
  0x49   : > { %v323_v34 = vsel %vm301_vm1, %v320_v29, %v322_v32  ;;  %v536_v44 = vmul.f32 %v1353_v41, %v534_v42  ;;  %v535_v45 = vmul.f32 %v1356_v43, %v534_v42  ;;  %s1366_s20 = sld [smem:[#allocation2 + $0x17]]  ;;  %v697_v47 = vstv %s1330_s5 }
  0x4a   : > { %266 = vrot.lane.b32.xlu1 %v263_v25, %s1184_s29  ;;  %264 = vrot.lane.b32.xlu0 %v261_v26, %s1184_s29  ;;  %v321_v35 = vsel %vm301_vm1, %v319_v33, %v320_v29  ;;  %v385_v49 = vstv %s1334_s6  ;;  %v416_v51 = vstv %s972_s8  ;;  %v699_v54 = vmul.f32 %v1369_v46, %v697_v47  ;;  %s1394_s24 = sld [smem:[#allocation2 + $0x20]] }
  0x4b   : > { %v548_v52 = vstv %s1344_s7  ;;  %v579_v53 = vstv %s987_s9  ;;  %v698_v55 = vmul.f32 %v1373_v48, %v697_v47  ;;  %v387_v56 = vmul.f32 %v1339_v36, %v385_v49  ;;  %s1420_s25 = sld [smem:[#allocation2 + $0x10]] }
  0x4c   : > { %v711_v57 = vstv %s1350_s10  ;;  %v1387_v58 = vmul.f32 %v1339_v36, %v416_v51  ;;  %v419_v59 = vmul.f32 %v1377_v50, %v416_v51  ;;  %v417_v60 = vmul.f32 %v1342_v38, %v416_v51  ;;  %s1428_s26 = sld [smem:[#allocation2 + $0x3]] }
  0x4d   : > { %v742_v62 = vstv %s1002_s11  ;;  %v386_v63 = vmul.f32 %v1342_v38, %v385_v49  ;;  %v550_v0 = vmul.f32 %v1353_v41, %v548_v52  ;;  %v549_v3 = vmul.f32 %v1356_v43, %v548_v52  ;;  %s1435_s27 = sld [smem:[#allocation2 + $0x6]] }
  0x4e   : > { %287 = vrot.lane.b32.xlu1 %v284_v30, %s1183_s28  ;;  %285 = vrot.lane.b32.xlu0 %v282_v31, %s1183_s28  ;;  %v581_v5 = vmul.f32 %v1353_v41, %v579_v53  ;;  %v1404_v7 = vmul.f32 %v1369_v46, %v711_v57  ;;  %v1407_v8 = vmul.f32 %v1373_v48, %v711_v57  ;;  %v437_v9 = vstv %s1358_s17  ;;  %s1451_s30 = sld [smem:[#allocation2 + $0x19]] }
  0x4f   : > { %v333_v10 = vstv %s1360_s19  ;;  %v582_v11 = vmul.f32 %v1392_v61, %v579_v53  ;;  %v580_v12 = vmul.f32 %v1356_v43, %v579_v53  ;;  %v744_v13 = vmul.f32 %v1369_v46, %v742_v62  ;;  %s1461_s4 = sld [smem:[#allocation2 + $0x22]] }
  0x50   : > { %v600_v14 = vstv %s1366_s20  ;;  %v424_v15 = vrot.slane %v1387_v58, 1  ;;  %v426_v16 = vrot.slane %v419_v59, 1  ;;  %v423_v17 = vrot.slane %v417_v60, 1  ;;  %s1468_s5 = sld [smem:[#allocation2 + $0xc]] }
  0x51   : > { %v745_v18 = vmul.f32 %v1401_v6, %v742_v62  ;;  %v587_v19 = vrot.slane %v581_v5, 1  ;;  %v743_v20 = vmul.f32 %v1373_v48, %v742_v62  ;;  %v335_v21 = vmul.f32 %v333_v10, %v1302_v2  ;;  %s1481_s6 = sld [smem:[#allocation2 + $0x15]] }
  0x52   : > { %326 = vrot.lane.b32.xlu1 %v323_v34, %s1184_s29  ;;  %324 = vrot.lane.b32.xlu0 %v321_v35, %s1184_s29  ;;  %v336_v22 = vmul.f32 %v333_v10, %v1305_v4  ;;  %v439_v23 = vmul.f32 %v1339_v36, %v437_v9  ;;  %v440_v24 = vmul.f32 %v1377_v50, %v437_v9  ;;  %v589_v31 = vrot.slane %v582_v11, 1  ;;  %s1489_s7 = sld [smem:[#allocation2 + $0x1e]] }
  0x53   : > { %v438_v25 = vmul.f32 %v1342_v38, %v437_v9  ;;  %v334_v26 = vmul.f32 %v333_v10, %v1299_v1  ;;  %v602_v27 = vmul.f32 %v1353_v41, %v600_v14  ;;  %v603_v28 = vmul.f32 %v1392_v61, %v600_v14  ;;  %s1511_s8 = sld [smem:[#allocation2 + $0xf]] }
  0x54   : > { %v341_v29 = vrot.slane %v335_v21, 2  ;;  %v343_v30 = vrot.slane %v336_v22, 2  ;;  %v586_v32 = vrot.slane %v580_v12, 1  ;;  %v763_v33 = vstv %s1394_s24  ;;  %s1523_s9 = sld [smem:[#allocation2 + $0x18]] }
  0x55   : > { %v340_v34 = vrot.slane %v334_v26, 2  ;;  %v750_v35 = vrot.slane %v744_v13, 1  ;;  %v752_v37 = vrot.slane %v745_v18, 1  ;;  %v445_v42 = vrot.slane %v439_v23, 1  ;;  %s1535_s10 = sld [smem:[#allocation2 + $0x21]] }
  0x56   : > { %378 = vrot.lane.b32.xlu1 %v373_v39, %s1184_s29  ;;  %376 = vrot.lane.b32.xlu0 %v372_v40, %s1184_s29  ;;  %v749_v39 = vrot.slane %v743_v20, 1  ;;  %v1438_v40 = vsel %vm301_vm1, %v341_v29, %v343_v30  ;;  %v444_v49 = vrot.slane %v438_v25, 1  ;;  %v608_v51 = vrot.slane %v602_v27, 1  ;;  %s976_s11 = sld [smem:[#allocation2 + $0x11]] }
  0x57   : > { %v1442_v47 = vsel %vm301_vm1, %v340_v34, %v341_v29  ;;  %v610_v52 = vrot.slane %v603_v28, 1  ;;  %v765_v53 = vmul.f32 %v1369_v46, %v763_v33  ;;  %v588_v57 = vsel %vm241_vm0, %v586_v32, %v587_v19  ;;  %s991_s17 = sld [smem:[#allocation2 + $0x1a]] }
  0x58   : > { %v1454_v58 = vsel %vm241_vm0, %v750_v35, %v752_v37  ;;  %v1457_v59 = vsel %vm241_vm0, %v749_v39, %v750_v35  ;;  %v766_v60 = vmul.f32 %v1401_v6, %v763_v33  ;;  %v475_v62 = vstv %s1420_s25  ;;  %s1006_s19 = sld [smem:[#allocation2 + $0x23]] }
  0x59   : > { %v234_v5 = vstv %s1428_s26  ;;  %v1475_v9 = vsel %vm241_vm0, %v444_v49, %v445_v42  ;;  %v1478_v10 = vsel %vm241_vm0, %v608_v51, %v610_v52  ;;  %v771_v11 = vrot.slane %v765_v53, 1  ;;  %s983_s20 = sld [smem:[#allocation2 + $0x12]]  ;;  %s188_s26 = sand.u32 1, %s1171_s13  }
  0x5a   : > { %541 = vrot.lane.b32.xlu1 %v536_v44, %s1184_s29  ;;  %539 = vrot.lane.b32.xlu0 %v535_v45, %s1184_s29  ;;  %v447_v44 = vrot.slane %v440_v24, 1  ;;  %v601_v45 = vmul.f32 %v1356_v43, %v600_v14  ;;  %v236_v12 = vmul.f32 %v234_v5, %v1302_v2  ;;  %v1484_v13 = vmul.f32 %v1339_v36, %v475_v62  ;;  %s998_s24 = sld [smem:[#allocation2 + $0x1b]] }
  0x5b   : > { %v237_v14 = vmul.f32 %v234_v5, %v1305_v4  ;;  %v1500_v24 = vmul.f32 %v1377_v50, %v475_v62  ;;  %v1503_v26 = vmul.f32 %v1342_v38, %v475_v62  ;;  %v1518_v32 = vstv %s1461_s4  ;;  %s353_s25 = sld [smem:[#allocation5]] }
  0x5c   : > { %v483_v30 = vrot.slane %v1484_v13, 2  ;;  %v399_v39 = vstv %s1468_s5  ;;  %v562_v49 = vstv %s1481_s6  ;;  %s1708_s4 = sld [smem:[#allocation5 + $0x2]] }
  0x5d   : > { %v245_v20 = vrot.slane %v237_v14, 1  ;;  %v565_v52 = vmul.f32 %v1392_v61, %v562_v49  ;;  %v563_v53 = vmul.f32 %v1356_v43, %v562_v49  ;;  %s1710_s5 = sld [smem:[#allocation5 + $0x3]] }
  0x5e   : > { %704 = vrot.lane.b32.xlu1 %v699_v54, %s1184_s29  ;;  %702 = vrot.lane.b32.xlu0 %v698_v55, %s1184_s29  ;;  %v427_v54 = vsel %vm241_vm0, %v424_v15, %v426_v16  ;;  %v425_v55 = vsel %vm241_vm0, %v423_v17, %v424_v15  ;;  %v294_v15 = vstv %s1435_s27  ;;  %v243_v16 = vrot.slane %v236_v12, 1  ;;  %s977_s27 = sld [smem:[#allocation5 + $0x1]] }
  0x5f   : > { %v296_v17 = vmul.f32 %v294_v15, %v1302_v2  ;;  %v297_v18 = vmul.f32 %v294_v15, %v1305_v4  ;;  %v295_v22 = vmul.f32 %v294_v15, %v1299_v1 }
  0x60   : > { %v1506_v27 = vsel %vm241_vm0, %v243_v16, %v245_v20  ;;  %v485_v20 = vrot.slane %v1500_v24, 2 }
  0x61   : > { %v303_v25 = vrot.slane %v296_v17, 2  ;;  %v305_v4 = vrot.slane %v297_v18, 2  ;;  %v302_v29 = vrot.slane %v295_v22, 2  ;;  %v621_v22 = vstv %s1523_s9 }
  0x62   : > { %392 = vrot.lane.b32.xlu1 %v387_v56, %s1183_s28  ;;  %390 = vrot.lane.b32.xlu0 %v386_v63, %s1183_s28  ;;  %v590_v56 = vsel %vm241_vm0, %v587_v19, %v589_v31  ;;  %v1464_v63 = vsel %vm241_vm0, %v445_v42, %v447_v44  ;;  %v1515_v31 = vstv %s1451_s30  ;;  %v401_v42 = vmul.f32 %v1339_v36, %v399_v39  ;;  %s955_s30 = sshll.u32 %s188_s26, 6 }
  0x63   : > { %v1532_v37 = vsel %vm301_vm1, %v302_v29, %v303_v25  ;;  %v402_v44 = vmul.f32 %v1377_v50, %v399_v39  ;;  %v624_v24 = vmul.f32 %v1392_v61, %v621_v22  ;;  %s1712_s6 = scalar_lea.vmem [#allocation7], %s955_s30 }
  0x66   : > { %555 = vrot.lane.b32.xlu1 %v550_v0, %s1183_s28  ;;  %553 = vrot.lane.b32.xlu0 %v549_v3, %s1183_s28  ;;  %v607_v0 = vrot.slane %v601_v45, 1  ;;  %v764_v3 = vmul.f32 %v1373_v48, %v763_v33  ;;  %v1521_v33 = vsel %vm301_vm1, %v303_v25, %v305_v4  ;;  %v400_v45 = vmul.f32 %v1342_v38, %v399_v39 }
  0x67   : > { %v784_v25 = vstv %s1535_s10 }
  0x68   : > { %v770_v19 = vrot.slane %v764_v3, 1  ;;  %v1497_v23 = vsel %vm241_vm0, %v607_v0, %v608_v51  ;;  %v564_v51 = vmul.f32 %v1353_v41, %v562_v49  ;;  %v572_v0 = vrot.slane %v565_v52, 1 }
  0x69   : > { %v569_v3 = vrot.slane %v563_v53, 1  ;;  %v786_v49 = vmul.f32 %v1369_v46, %v784_v25  ;;  %v785_v52 = vmul.f32 %v1373_v48, %v784_v25 }
  0x6a   : > { %718 = vrot.lane.b32.xlu1 %v1404_v7, %s1183_s28  ;;  %716 = vrot.lane.b32.xlu0 %v1407_v8, %s1183_s28  ;;  %v235_v7 = vmul.f32 %v234_v5, %v1299_v1  ;;  %v773_v8 = vrot.slane %v766_v60, 1  ;;  %v1529_v35 = vsel %vm241_vm0, %v770_v19, %v771_v11  ;;  %v409_v60 = vrot.slane %v402_v44, 1 }
  0x6b   : > { %v570_v62 = vrot.slane %v564_v51, 1  ;;  %v623_v44 = vmul.f32 %v1353_v41, %v621_v22 }
  0x6c   : > { %v242_v21 = vrot.slane %v235_v7, 1  ;;  %v1526_v34 = vsel %vm241_vm0, %v771_v11, %v773_v8 }
  0x6d   : > { %v1561_v15 = vsel %vm241_vm0, %v570_v62, %v572_v0  ;;  %v1564_v8 = vsel %vm241_vm0, %v569_v3, %v570_v62  ;;  %v629_v53 = vrot.slane %v623_v44, 2  ;;  %v791_v0 = vrot.slane %v785_v52, 2 }
  0x6e   : > { %430 = vrot.lane.b32.xlu1 %v427_v54, %s1184_s29  ;;  %428 = vrot.lane.b32.xlu0 %v425_v55, %s1184_s29  ;;  %v1509_v28 = vsel %vm241_vm0, %v242_v21, %v243_v16  ;;  %v725_v54 = vstv %s1489_s7  ;;  %v407_v55 = vrot.slane %v401_v42, 1  ;;  %v458_v16 = vstv %s1511_s8  ;;  %s1015_s7 = sshll.u32 %s1229_s16, 10  ;;  %s863_s8 = sshll.u32 %s1712_s6, 4  ;;  %s1735_s8 = int_to_ptr.vmem [resolvable:$true] %s863_s8 }
  0x6f   : > { %v728_v5 = vmul.f32 %v1401_v6, %v725_v54  ;;  %v726_v7 = vmul.f32 %v1373_v48, %v725_v54  ;;  %v461_v18 = vmul.f32 %v1377_v50, %v458_v16  ;;  %v459_v19 = vmul.f32 %v1342_v38, %v458_v16  ;;  %s1743_s16 = scalar_lea.sflag [#allocation3], %s188_s26 }
  0x70   : > { %v1554_v11 = vsel %vm241_vm0, %v407_v55, %v409_v60  ;;  %v792_v60 = vrot.slane %v786_v49, 2  ;;  %v641_v3 = vmul.f32 %v1392_v61, %v1515_v31  ;;  %v659_v44 = vstv %s991_s17  ;;  %s1111_s17 = scalar_lea.vmem %s1735_s8, 1024 }
  0x71   : > { %v732_v17 = vrot.slane %v726_v7, 1  ;;  %v468_v39 = vrot.slane %v461_v18, 2  ;;  %v465_v42 = vrot.slane %v459_v19, 2  ;;  %v803_v7 = vmul.f32 %v1369_v46, %v1518_v32  ;;  %p1112_p10 = scmp.ne.s32.totalorder %s1735_s8, %s1111_s17 }
  0x72   : > { %593 = vrot.lane.b32.xlu1 %v590_v56, %s1184_s29  ;;  %591 = vrot.lane.b32.xlu0 %v588_v57, %s1184_s29  ;;  %v406_v56 = vrot.slane %v400_v45, 1  ;;  %v727_v57 = vmul.f32 %v1369_v46, %v725_v54  ;;  %v622_v45 = vmul.f32 %v1356_v43, %v621_v22  ;;  %v631_v54 = vrot.slane %v624_v24, 2 }
  0x73   : > { %v496_v19 = vstv %s976_s11  ;;  %v662_v52 = vmul.f32 %v1392_v61, %v659_v44  ;;  %s1733_s11 = scalar_lea.hbm %s1786_s3, %s1015_s7  ;;  %p1113_p0 = pnand %p1112_p10, %p1799_p12 }
  0x74   : > { %v1557_v12 = vsel %vm241_vm0, %v406_v56, %v407_v55  ;;  %v733_v14 = vrot.slane %v727_v57, 1  ;;  %v628_v55 = vrot.slane %v622_v45, 2  ;;  %v482_v56 = vrot.slane %v1503_v26, 2 }
  0x75   : > { %v640_v57 = vmul.f32 %v1353_v41, %v1515_v31  ;;  %v1616_v26 = vsel %vm301_vm1, %v791_v0, %v792_v60  ;;  %p1114_p7 = pneg %p1113_p0 }
  0x76   : > { %756 = vrot.lane.b32.xlu1 %v1454_v58, %s1184_s29  ;;  %754 = vrot.lane.b32.xlu0 %v1457_v59, %s1184_s29  ;;  %v735_v58 = vrot.slane %v728_v5, 1  ;;  %v460_v59 = vmul.f32 %v1339_v36, %v458_v16  ;;  %v1581_v4 = vsel %vm241_vm0, %v732_v17, %v733_v14  ;;  %v639_v5 = vmul.f32 %v1356_v43, %v1515_v31 }
  0x77   : > { %v486_v31 = vsel %vm301_vm1, %v483_v30, %v485_v20  ;;  %v804_v16 = vmul.f32 %v1401_v6, %v1518_v32  ;;  %v646_v17 = vrot.slane %v640_v57, 2  ;;  %v669_v57 = vrot.slane %v662_v52, 2 }
  0x78   : > { %v1572_v21 = vsel %vm241_vm0, %v733_v14, %v735_v58  ;;  %v466_v29 = vrot.slane %v460_v59, 2  ;;  %v1607_v14 = vsel %vm301_vm1, %v629_v53, %v631_v54  ;;  %v484_v58 = vsel %vm301_vm1, %v482_v56, %v483_v30 }
  0x79   : > { %v648_v59 = vrot.slane %v641_v3, 2  ;;  %v645_v18 = vrot.slane %v639_v5, 2  ;;  %v811_v20 = vrot.slane %v804_v16, 2 }
  0x7a   : > { %451 = vrot.lane.b32.xlu1 %v1464_v63, %s1183_s28  ;;  %449 = vrot.lane.b32.xlu0 %v1475_v9, %s1183_s28  ;;  %v1588_v51 = vsel %vm301_vm1, %v466_v29, %v468_v39  ;;  %v1591_v63 = vsel %vm301_vm1, %v465_v42, %v466_v29  ;;  %v787_v9 = vmul.f32 %v1401_v6, %v784_v25 }
  0x7b   : > { %v649_v13 = vsel %vm301_vm1, %v646_v17, %v648_v59  ;;  %v647_v30 = vsel %vm301_vm1, %v645_v18, %v646_v17  ;;  %v499_v25 = vmul.f32 %v1377_v50, %v496_v19  ;;  %v497_v29 = vmul.f32 %v1342_v38, %v496_v19 }
  0x7c   : > { %v794_v62 = vrot.slane %v787_v9, 2  ;;  %v661_v9 = vmul.f32 %v1353_v41, %v659_v44  ;;  %v660_v50 = vmul.f32 %v1356_v43, %v659_v44 }
  0x7d   : > { %v506_v45 = vrot.slane %v499_v25, 2  ;;  %v503_v49 = vrot.slane %v497_v29, 2 }
  0x7e   : > { %614 = vrot.lane.b32.xlu1 %v1478_v10, %s1183_s28  ;;  %612 = vrot.lane.b32.xlu0 %v1497_v23, %s1183_s28  ;;  %v1610_v10 = vsel %vm301_vm1, %v628_v55, %v629_v53  ;;  %v1613_v23 = vsel %vm301_vm1, %v792_v60, %v794_v62  ;;  %v822_v53 = vstv %s1006_s19  ;;  %v667_v60 = vrot.slane %v661_v9, 2  ;;  %s1185_s19 = smov [#allocation7]  }
  0x7f   : > { %v824_v56 = vmul.f32 %v1369_v46, %v822_v53  ;;  %v666_v62 = vrot.slane %v660_v50, 2  ;;  %v825_v61 = vmul.f32 %v1401_v6, %v822_v53  ;;  %v823_v0 = vmul.f32 %v1373_v48, %v822_v53 }
  0x81   : > { %v668_v3 = vsel %vm301_vm1, %v666_v62, %v667_v60  ;;  %v832_v5 = vrot.slane %v825_v61, 2 }
  0x82   : > { %777 = vrot.lane.b32.xlu1 %v1526_v34, %s1183_s28  ;;  %775 = vrot.lane.b32.xlu0 %v1529_v35, %s1183_s28  ;;  %v802_v34 = vmul.f32 %v1373_v48, %v1518_v32  ;;  %v809_v35 = vrot.slane %v803_v7, 2  ;;  %v498_v32 = vmul.f32 %v1339_v36, %v496_v19  ;;  %v829_v7 = vrot.slane %v823_v0, 2 }
  0x84   : > { %v808_v22 = vrot.slane %v802_v34, 2  ;;  %v812_v39 = vsel %vm301_vm1, %v809_v35, %v811_v20  ;;  %v504_v24 = vrot.slane %v498_v32, 2 }
  0x86   : > { %489 = vrot.lane.b32.xlu1 %v486_v31, %s1184_s29  ;;  %487 = vrot.lane.b32.xlu0 %v484_v58, %s1184_s29  ;;  %v810_v42 = vsel %vm301_vm1, %v808_v22, %v809_v35  ;;  %v507_v54 = vsel %vm301_vm1, %v504_v24, %v506_v45  ;;  %v505_v55 = vsel %vm301_vm1, %v503_v49, %v504_v24 }
  0x8a   : > { %652 = vrot.lane.b32.xlu1 %v649_v13, %s1184_s29  ;;  %650 = vrot.lane.b32.xlu0 %v647_v30, %s1184_s29 }
  0x8e   : > { %815 = vrot.lane.b32.xlu1 %v812_v39, %s1184_s29  ;;  %813 = vrot.lane.b32.xlu0 %v810_v42, %s1184_s29  ;;  %s199_s29 = sld [smem:[#allocation2]] }
  0x92   : > { %347 = vrot.lane.b32.xlu1 %v1438_v40, %s1183_s28  ;;  %345 = vrot.lane.b32.xlu0 %v1442_v47, %s1183_s28  ;;  %v830_v40 = vrot.slane %v824_v56, 2  ;;  %v670_v47 = vsel %vm301_vm1, %v667_v60, %v669_v57  ;;  %v528_v60 = vstv %s983_s20 }
  0x93   : > { %v530_v57 = vmul.f32 %v1353_v41, %v528_v60  ;;  %v529_v0 = vmul.f32 %v1356_v43, %v528_v60 }
  0x94   : > { %v833_v31 = vsel %vm301_vm1, %v830_v40, %v832_v5  ;;  %v831_v6 = vsel %vm301_vm1, %v829_v7, %v830_v40  ;;  %v200_v58 = vstv %s199_s29  ;;  %v691_v40 = vstv %s998_s24  ;;  %s1115_s29 = sshll.u32 %s1185_s19, 4  ;;  %s1116_s29 = int_to_ptr.vmem [resolvable:$false] %s1115_s29 }
  0x95   : > { %v201_v16 = vmul.f32 %v200_v58, %v1299_v1  ;;  %v202_v34 = vmul.f32 %v200_v58, %v1302_v2  ;;  %p1118_p8 = scmp.lt.s32.totalorder %s1735_s8, %s1116_s29 }
  0x96   : > { %510 = vrot.lane.b32.xlu1 %v507_v54, %s1183_s28  ;;  %508 = vrot.lane.b32.xlu0 %v505_v55, %s1183_s28 }
  0x9a   : > { %673 = vrot.lane.b32.xlu1 %v670_v47, %s1183_s28  ;;  %671 = vrot.lane.b32.xlu0 %v668_v3, %s1183_s28 }
  0x9e   : > { %836 = vrot.lane.b32.xlu1 %v833_v31, %s1183_s28  ;;  %834 = vrot.lane.b32.xlu0 %v831_v6, %s1183_s28  ;;  %s968_s28 = sld [smem:[#allocation2 + $0x9]]  ;;  %v693_v31 = vmul.f32 %v1369_v46, %v691_v40 }
  0xa4   : > { %v365_v50 = vstv %s968_s28  ;;  %s1117_s28 = scalar_lea.vmem %s1116_s29, 2048 }
  0xa5   : > { %v367_v55 = vmul.f32 %v1339_v36, %v365_v50  ;;  %v692_v36 = vmul.f32 %v1373_v48, %v691_v40  ;;  %p1119_p11 = scmp.lt.s32.totalorder %s1117_s28, %s1111_s17 }
  0xa7   : > { %p1120_p13 = por %p1119_p11, %p1118_p8 }
  0xa9   : > { %p1121_p1 = pnand %p1120_p13, %p1114_p7 }
  0xb4   : > { %v226_v17 = vpop.permute.xlu1 %225  ;;  %v212_v59 = vpop.permute.xlu0 %211 }
  0xb5   : > { %v217_v18 = vadd.f32 %v212_v59, %v201_v16 }
  0xb7   : > { %v231_v35 = vadd.f32 %v226_v17, %v217_v18 }
  0xb8   : > { %v228_v19 = vpop.permute.xlu1 %227  ;;  %v214_v13 = vpop.permute.xlu0 %213 }
  0xb9   : > { %v218_v30 = vadd.f32 %v214_v13, %v202_v34  ;;  %v249_v20 = vadd.f32 %v1509_v28, %v231_v35 }
  0xbb   : > { %v232_v22 = vadd.f32 %v228_v19, %v218_v30 }
  0xbc   : > { %v267_v32 = vpop.permute.xlu1 %266  ;;  %v265_v25 = vpop.permute.xlu0 %264 }
  0xbd   : > { %v250_v29 = vadd.f32 %v1506_v27, %v232_v22  ;;  %v270_v39 = vadd.f32 %v265_v25, %v249_v20 }
  0xbf   : > { %v271_v42 = vadd.f32 %v267_v32, %v250_v29 }
  0xc0   : > { %v288_v44 = vpop.permute.xlu1 %287  ;;  %v286_v1 = vpop.permute.xlu0 %285 }
  0xc1   : > { %v292_v24 = vadd.f32 %v288_v44, %v271_v42  ;;  %v291_v45 = vadd.f32 %v286_v1, %v270_v39 }
  0xc3   : > { %v1674_v49 = vadd.f32 %v1521_v33, %v292_v24  ;;  %v1677_v2 = vadd.f32 %v1532_v37, %v291_v45  ;;  %v366_v33 = vmul.f32 %v1342_v38, %v365_v50 }
  0xc4   : > { %v1679_v9 = vpop.permute.xlu1 %326  ;;  %v1681_v28 = vpop.permute.xlu0 %324 }
  0xc8   : > { %v379_v52 = vpop.permute.xlu1 %378  ;;  %v377_v27 = vpop.permute.xlu0 %376 }
  0xc9   : > { %v383_v62 = vadd.f32 %v379_v52, %v367_v55  ;;  %v382_v61 = vadd.f32 %v377_v27, %v366_v33 }
  0xcc   : > { %v542_v53 = vpop.permute.xlu1 %541  ;;  %v540_v54 = vpop.permute.xlu0 %539 }
  0xcd   : > { %v546_v6 = vadd.f32 %v542_v53, %v530_v57  ;;  %v545_v38 = vadd.f32 %v540_v54, %v529_v0 }
  0xd0   : > { %v705_v56 = vpop.permute.xlu1 %704  ;;  %v703_v37 = vpop.permute.xlu0 %702 }
  0xd1   : > { %v709_v43 = vadd.f32 %v705_v56, %v693_v31  ;;  %v708_v34 = vadd.f32 %v703_v37, %v692_v36 }
  0xd4   : > { %v393_v47 = vpop.permute.xlu1 %392  ;;  %v391_v3 = vpop.permute.xlu0 %390 }
  0xd5   : > { %v397_v5 = vadd.f32 %v393_v47, %v383_v62  ;;  %v396_v7 = vadd.f32 %v391_v3, %v382_v61 }
  0xd7   : > { %v414_v58 = vadd.f32 %v1554_v11, %v397_v5  ;;  %v413_v16 = vadd.f32 %v1557_v12, %v396_v7 }
  0xd8   : > { %v556_v41 = vpop.permute.xlu1 %555  ;;  %v554_v17 = vpop.permute.xlu0 %553 }
  0xd9   : > { %v560_v59 = vadd.f32 %v556_v41, %v546_v6  ;;  %v559_v18 = vadd.f32 %v554_v17, %v545_v38  ;;  %v517_v17 = vstv %s977_s27 }
  0xdb   : > { %v577_v35 = vadd.f32 %v1561_v15, %v560_v59  ;;  %v576_v19 = vadd.f32 %v1564_v8, %v559_v18 }
  0xdc   : > { %v719_v13 = vpop.permute.xlu1 %718  ;;  %v717_v46 = vpop.permute.xlu0 %716 }
  0xdd   : > { %v723_v30 = vadd.f32 %v719_v13, %v709_v43  ;;  %v722_v48 = vadd.f32 %v717_v46, %v708_v34 }
  0xdf   : > { %v740_v20 = vadd.f32 %v1572_v21, %v723_v30  ;;  %v739_v11 = vadd.f32 %v1581_v4, %v722_v48 }
  0xe0   : > { %v431_v22 = vpop.permute.xlu1 %430  ;;  %v429_v12 = vpop.permute.xlu0 %428 }
  0xe1   : > { %v435_v42 = vadd.f32 %v431_v22, %v414_v58  ;;  %v434_v44 = vadd.f32 %v429_v12, %v413_v16  ;;  %v843_v12 = vstv %s1710_s5 }
  0xe4   : > { %v594_v32 = vpop.permute.xlu1 %593  ;;  %v592_v25 = vpop.permute.xlu0 %591 }
  0xe5   : > { %v598_v45 = vadd.f32 %v594_v32, %v577_v35  ;;  %v597_v52 = vadd.f32 %v592_v25, %v576_v19  ;;  %v680_v35 = vstv %s1708_s4 }
  0xe8   : > { %v757_v29 = vpop.permute.xlu1 %756  ;;  %v755_v39 = vpop.permute.xlu0 %754 }
  0xe9   : > { %v761_v55 = vadd.f32 %v757_v29, %v740_v20  ;;  %v760_v33 = vadd.f32 %v755_v39, %v739_v11 }
  0xec   : > { %v452_v1 = vpop.permute.xlu1 %451  ;;  %v450_v15 = vpop.permute.xlu0 %449 }
  0xed   : > { %v456_v24 = vadd.f32 %v452_v1, %v435_v42  ;;  %v455_v8 = vadd.f32 %v450_v15, %v434_v44 }
  0xef   : > { %v473_v27 = vadd.f32 %v1588_v51, %v456_v24  ;;  %v472_v21 = vadd.f32 %v1591_v63, %v455_v8 }
  0xf0   : > { %v615_v50 = vpop.permute.xlu1 %614  ;;  %v613_v4 = vpop.permute.xlu0 %612 }
  0xf1   : > { %v619_v53 = vadd.f32 %v615_v50, %v598_v45  ;;  %v618_v54 = vadd.f32 %v613_v4, %v597_v52 }
  0xf3   : > { %v636_v60 = vadd.f32 %v1607_v14, %v619_v53  ;;  %v635_v56 = vadd.f32 %v1610_v10, %v618_v54  ;;  %v331_v14 = vadd.f32 %v1679_v9, %v1674_v49  ;;  %v330_v10 = vadd.f32 %v1681_v28, %v1677_v2 }
  0xf4   : > { %v778_v37 = vpop.permute.xlu1 %777  ;;  %v776_v57 = vpop.permute.xlu0 %775 }
  0xf5   : > { %v782_v62 = vadd.f32 %v778_v37, %v761_v55  ;;  %v781_v61 = vadd.f32 %v776_v57, %v760_v33 }
  0xf7   : > { %v799_v51 = vadd.f32 %v1613_v23, %v782_v62  ;;  %v798_v63 = vadd.f32 %v1616_v26, %v781_v61  ;;  %v354_v23 = vstv %s353_s25 }
  0xf8   : > { %v490_v0 = vpop.permute.xlu1 %489  ;;  %v488_v40 = vpop.permute.xlu0 %487 }
  0xf9   : > { %v494_v38 = vadd.f32 %v490_v0, %v473_v27  ;;  %v493_v58 = vadd.f32 %v488_v40, %v472_v21 }
  0xfc   : > { %v653_v47 = vpop.permute.xlu1 %652  ;;  %v651_v3 = vpop.permute.xlu0 %650 }
  0xfd   : > { %v657_v59 = vadd.f32 %v653_v47, %v636_v60  ;;  %v656_v18 = vadd.f32 %v651_v3, %v635_v56 }
 0x100   : > { %v816_v5 = vpop.permute.xlu1 %815  ;;  %v814_v7 = vpop.permute.xlu0 %813 }
 0x101   : > { %v820_v48 = vadd.f32 %v816_v5, %v799_v51  ;;  %v819_v20 = vadd.f32 %v814_v7, %v798_v63 }
 0x104   : > { %v348_v31 = vpop.permute.xlu1 %347  ;;  %v346_v26 = vpop.permute.xlu0 %345 }
 0x105   : > { %v352_v36 = vadd.f32 %v348_v31, %v331_v14  ;;  %v351_v6 = vadd.f32 %v346_v26, %v330_v10 }
 0x107   : > { %v356_v16 = vadd.f32 %v354_v23, %v352_v36  ;;  %v355_v41 = vadd.f32 %v354_v23, %v351_v6 }
 0x108   : > { %v511_v49 = vpop.permute.xlu1 %510  ;;  %v509_v9 = vpop.permute.xlu0 %508 }
 0x109   : > { %359 = vst.msk [vmem:[%s1712_s6 + $0x8] sm:$0xff] %vm357_vm2, %v356_v16  ;;  %358 = vst.msk [vmem:[%s1712_s6] sm:$0xff] %vm357_vm2, %v355_v41  ;;  %v515_v2 = vadd.f32 %v511_v49, %v494_v38  ;;  %v514_v28 = vadd.f32 %v509_v9, %v493_v58 }
 0x10b   : > { %v519_v43 = vadd.f32 %v517_v17, %v515_v2  ;;  %v518_v34 = vadd.f32 %v517_v17, %v514_v28 }
 0x10c   : > { %v674_v19 = vpop.permute.xlu1 %673  ;;  %v672_v13 = vpop.permute.xlu0 %671 }
 0x10d   : > { %979 = vst.msk [vmem:[%s1712_s6 + $0x18] sm:$0xff] %vm357_vm2, %v519_v43  ;;  %978 = vst.msk [vmem:[%s1712_s6 + $0x10] sm:$0xff] %vm357_vm2, %v518_v34  ;;  %v678_v46 = vadd.f32 %v674_v19, %v657_v59  ;;  %v677_v30 = vadd.f32 %v672_v13, %v656_v18 }
 0x10f   : > { %v682_v11 = vadd.f32 %v680_v35, %v678_v46  ;;  %v681_v22 = vadd.f32 %v680_v35, %v677_v30 }
 0x110   : > { %v837_v32 = vpop.permute.xlu1 %836  ;;  %v835_v25 = vpop.permute.xlu0 %834 }
 0x111   : > { %994 = vst.msk [vmem:[%s1712_s6 + $0x28] sm:$0xff] %vm357_vm2, %v682_v11  ;;  %993 = vst.msk [vmem:[%s1712_s6 + $0x20] sm:$0xff] %vm357_vm2, %v681_v22  ;;  %v841_v29 = vadd.f32 %v837_v32, %v820_v48  ;;  %v840_v39 = vadd.f32 %v835_v25, %v819_v20 }
 0x113   : > { %v845_v42 = vadd.f32 %v843_v12, %v841_v29  ;;  %v844_v44 = vadd.f32 %v843_v12, %v840_v39 }
 0x115   : > { %1009 = vst.msk [vmem:[%s1712_s6 + $0x38] sm:$0xff] %vm357_vm2, %v845_v42  ;;  %1008 = vst.msk [vmem:[%s1712_s6 + $0x30] sm:$0xff] %vm357_vm2, %v844_v44 }
 0x116   : > { %1124 = shalt.err (!%p1121_p1)
}
 0x117   : > { %s1125_s20 = scalar_lea.hbm %s1733_s11, 1024  ;;  %s1129_s26 = scalar_lea.hbm %s1786_s3, 2048 }
 0x118   : > { %p1126_p2 = scmp.ne.s32.totalorder %s1733_s11, %s1125_s20  ;;  %p1130_p9 = scmp.lt.s32.totalorder %s1733_s11, %s1786_s3 }
 0x119   : > { %p1131_p5 = scmp.lt.s32.totalorder %s1129_s26, %s1125_s20 }
 0x11a   : > { %p1127_p3 = pnand %p1126_p2, %p1799_p12 }
 0x11b   : > { %p1132_p6 = por %p1131_p5, %p1130_p9 }
 0x11c   : > { %p1128_p4 = pneg %p1127_p3 }
 0x11e   : > { %p1133_p10 = pnand %p1132_p6, %p1128_p4 }
 0x120   : > { %1136 = shalt.err (!%p1133_p10)
}
 0x121   : > { %s1186_s4 = smov 128   ;;  %s1187_s5 = smov 8  }
 0x122   : > { %1025 = dma.vmem_to_hbm [thread:$0]  (%p1799_p12), %s1735_s8, 1024, %s1733_s11, %s1743_s16, %s1186_s4, %s1186_s4, %s1187_s5  }
 0x123 PF: > { %p1042_p0 = scmp.ge.s32.totalorder %s1179_s15, 2  ;;  %s878_s6 = sand.u32 1, %s1167_s12  }
 0x124   : > { %p1800_p7 = scmp.ne.s32.totalorder %s1791_s23, 0  ;;  %s879_s7 = scalar_lea.sflag [#allocation3], %s878_s6 }
 0x126   : > { %p1035_p8 = pnand %p1042_p0, %p1800_p7 }
 0x128   : > { %p1036_p11 = pneg %p1035_p8 }
 0x12a   : > { %1162 = dma.done.wait (%p1036_p11), %s879_s7, 1024  }
 0x12b   : > { %1164 = vsyncadd (%p1036_p11), %s879_s7, 4294966272  ;;  %p15_p13 = scmp.ge.s32.totalorder %s1233_s18, 4   ;;  %s1801_s12 = smov %s1171_s13 }
 0x12c   : > { %s1802_s13 = smov %s1175_s14  ;;  %s1803_s14 = smov %s1244_s21 }
 0x12d   : > { %s1804_s15 = smov %s1233_s18  ;;  %17 = sbr.rel (!%p15_p13) target bundleno = 5 (0x5), region = 82 }
 0x132   :  { %884 = vsyncpa [#allocation3], 1 }
 0x133   :  { %886 = vsyncpa [#allocation3 + $0x1], 1 }
 0x134   :  { %887 = vsyncpa [#allocation4], 1 }
 0x135   :  { %889 = vsyncpa [#allocation4 + $0x1], 1 }
 0x136   :  { %890 = vsyncpa [#allocation6], 1 }

</bundles_post_ra>
